<compile_context>
chip_gen: v7x
topology: tpu7x:2x2x1
jax: 0.10.0
libtpu: 0.0.40
codegen_flags: <defaults>
</compile_context>

<pallas_src>
import jax
import jax.numpy as jnp
from jax.experimental import pallas as pl
from jax.experimental.pallas import tpu as pltpu


# ----------------------------------------------------------------------------
# helpers
# ----------------------------------------------------------------------------
def _round_up(x, m):
    return ((x + m - 1) // m) * m


def _pad_dim(d):
    """Lane-dim rule: >=128 -> pad to a multiple of 128 (unmasked stores);
    < 128 -> keep it (rounded to 8) and use a full-extent block (masked accesses,
    but 2-16x less HBM traffic on the narrow-channel layers)."""
    return _round_up(d, 128) if d >= 128 else _round_up(d, 8)


# ----------------------------------------------------------------------------
# tile selection (VMEM-budgeted, favors the largest M tile)
# ----------------------------------------------------------------------------
_VMEM_BUDGET = 12 * 1024 * 1024     # double-buffered working set; safe on v5e (16 MiB)
_TM_CAP = 4096


def _tm_candidates(mr):
    cands = []
    nb = 2 if mr >= 2048 else 1      # >=2 i-steps on big layers: pipelining + megacore
    while not cands or cands[-1] > 128:
        tm = _round_up(-(-mr // nb), 8)
        if tm <= _TM_CAP and (not cands or tm < cands[-1]):
            cands.append(tm)
        nb += 1
        if nb > 8192:
            break
    return cands


def _pick_tiles(mr, kp, np_, out_bytes):
    tn_opts = ([t for t in (512, 256, 128) if np_ % t == 0] if np_ >= 128 else [np_])
    tk_opts = ([t for t in (4096, 2048, 1024, 512, 256, 128) if kp % t == 0]
               if kp >= 128 else [kp])
    for tm in _tm_candidates(mr):
        for tk in tk_opts:
            for tn in tn_opts:
                need = 2 * tm * tk * 2 + 2 * tk * tn * 2 + 2 * tm * tn * out_bytes
                if kp // tk > 1:
                    need += tm * tn * 4              # f32 accumulator scratch
                need += 8 * tn * 4 + tn * 4          # stats + bias blocks
                if need <= _VMEM_BUDGET:
                    return tm, tk, tn
    return min(128, mr), min(128, kp), min(128, np_)


# ----------------------------------------------------------------------------
# Pallas matmul kernel (fused pre-activation, optional bias, optional BN stats)
# ----------------------------------------------------------------------------
def _make_mm_kernel(act_mode, has_bias, multi_k, want_stats):
    """act_mode: 0=none, 1=ReLU, 2=LeakyReLU(0.2); applied to the A tile (valid
    because act(0)==0, so spatial/K/M zero padding commutes with the activation)."""

    def _act(a):
        if act_mode == 1:
            return jnp.maximum(a, 0)
        if act_mode == 2:
            return jnp.where(a > 0, a, a * 0.2)
        return a

    def _finish(r, b_ref, o_ref, stats_ref):
        if b_ref is not None:
            r = r + b_ref[...]
        o_ref[...] = r.astype(o_ref.dtype)
        if stats_ref is not None:
            # per-(i,j)-block column sums / sums-of-squares from the f32 result,
            # computed before the (possibly bf16) output cast.
            s = jnp.sum(r, axis=0, keepdims=True)
            sq = jnp.sum(r * r, axis=0, keepdims=True)
            pad = jnp.zeros((6, r.shape[1]), jnp.float32)
            stats_ref[...] = jnp.concatenate([s, sq, pad], axis=0)

    def kernel(*refs):
        a_ref, w_ref = refs[0], refs[1]
        pos = 2
        b_ref = None
        if has_bias:
            b_ref = refs[pos]
            pos += 1
        o_ref = refs[pos]
        pos += 1
        stats_ref = None
        if want_stats:
            stats_ref = refs[pos]
            pos += 1

        if not multi_k:
            # single K step: no accumulator scratch, no init/finalize pl.when
            r = jnp.dot(_act(a_ref[...]), w_ref[...],
                        preferred_element_type=jnp.float32)
            _finish(r, b_ref, o_ref, stats_ref)
            return

        acc_ref = refs[pos]
        k = pl.program_id(2)

        @pl.when(k == 0)
        def _():
            acc_ref[...] = jnp.zeros_like(acc_ref)

        acc_ref[...] += jnp.dot(_act(a_ref[...]), w_ref[...],
                                preferred_element_type=jnp.float32)

        @pl.when(k == pl.num_programs(2) - 1)
        def _():
            _finish(acc_ref[...], b_ref, o_ref, stats_ref)

    return kernel


def matmul_bias_act(a, w, b, act_mode, *, want_stats=False,
                    out_dtype=jnp.bfloat16):
    """a: [M, K], w: [K, N], b: [N] or None.
    Returns (padded [Mp, Np] output of out_dtype, (col_sum[:N], col_sumsq[:N]) or None).
    MXU operands are bf16; accumulation and statistics are f32."""
    M, K = a.shape
    _, N = w.shape
    Kp = _pad_dim(K)
    Np = _pad_dim(N)
    Mr = _round_up(max(M, 8), 8)
    tm, tk, tn = _pick_tiles(Mr, Kp, Np, jnp.dtype(out_dtype).itemsize)
    Mp = _round_up(Mr, tm)
    ni, nj, nk = Mp // tm, Np // tn, Kp // tk
    multi_k = nk > 1
    has_bias = b is not None

    ap = a.astype(jnp.bfloat16)
    if (Mp, Kp) != (M, K):
        ap = jnp.pad(ap, ((0, Mp - M), (0, Kp - K)))
    wp = w.astype(jnp.bfloat16)
    if (Kp, Np) != (K, N):
        wp = jnp.pad(wp, ((0, Kp - K), (0, Np - N)))

    if multi_k:
        a_spec = pl.BlockSpec((tm, tk), lambda i, j, k: (i, k))
        w_spec = pl.BlockSpec((tk, tn), lambda i, j, k: (k, j))
        o_map = lambda i, j, k: (i, j)
        b_map = lambda i, j, k: (0, j)
        grid = (ni, nj, nk)
        dims = ("parallel", "parallel", "arbitrary")
        scratch = [pltpu.VMEM((tm, tn), jnp.float32)]
    else:
        a_spec = pl.BlockSpec((tm, tk), lambda i, j: (i, 0))
        w_spec = pl.BlockSpec((tk, tn), lambda i, j: (0, j))
        o_map = lambda i, j: (i, j)
        b_map = lambda i, j: (0, j)
        grid = (ni, nj)
        dims = ("parallel", "parallel")
        scratch = []

    in_specs = [a_spec, w_spec]
    operands = [ap, wp]
    if has_bias:
        bp = b.astype(jnp.float32)
        if Np != N:
            bp = jnp.pad(bp, (0, Np - N))
        in_specs.append(pl.BlockSpec((1, tn), b_map))
        operands.append(bp.reshape(1, Np))

    if want_stats:
        out_shape = (jax.ShapeDtypeStruct((Mp, Np), out_dtype),
                     jax.ShapeDtypeStruct((ni * 8, Np), jnp.float32))
        out_specs = (pl.BlockSpec((tm, tn), o_map),
                     pl.BlockSpec((8, tn), o_map))
    else:
        out_shape = jax.ShapeDtypeStruct((Mp, Np), out_dtype)
        out_specs = pl.BlockSpec((tm, tn), o_map)

    res = pl.pallas_call(
        _make_mm_kernel(act_mode, has_bias, multi_k, want_stats),
        out_shape=out_shape,
        grid_spec=pltpu.PrefetchScalarGridSpec(
            num_scalar_prefetch=0,
            grid=grid,
            in_specs=in_specs,
            out_specs=out_specs,
            scratch_shapes=scratch),
        compiler_params=pltpu.CompilerParams(
            dimension_semantics=dims,
            vmem_limit_bytes=32 * 1024 * 1024),
    )(*operands)

    if want_stats:
        out, st = res
        st = st.reshape(ni, 8, Np)
        sums = jnp.sum(st[:, 0, :], axis=0)[:N]
        sumsqs = jnp.sum(st[:, 1, :], axis=0)[:N]
        return out, (sums, sumsqs)
    return res, None


# ----------------------------------------------------------------------------
# conv / conv_transpose built on the Pallas matmul
# ----------------------------------------------------------------------------
def _extract_patches(x, k, stride):
    """x: [N, Hp, Wp, C] (already padded). Returns ([N, oh, ow, k*k*C], oh, ow)."""
    n, hp, wp, c = x.shape
    oh = (hp - k) // stride + 1
    ow = (wp - k) // stride + 1
    cols = []
    for kh in range(k):
        for kw in range(k):
            cols.append(x[:, kh:kh + stride * oh:stride,
                          kw:kw + stride * ow:stride, :])
    p = jnp.stack(cols, axis=3)                       # [N, oh, ow, k*k, C]
    return p.reshape(n, oh, ow, k * k * c), oh, ow


def conv2d(x, w, b, *, act_mode=0, want_stats=False, out_dtype=jnp.bfloat16):
    """4x4 / stride-2 / pad-1 conv. x: [N,H,W,Cin], w: [4,4,Cin,Cout].
    Pre-activation fused in the kernel; optional BN sums from the matmul epilogue."""
    n = x.shape[0]
    cin, cout = w.shape[2], w.shape[3]
    xp = jnp.pad(x.astype(jnp.bfloat16), ((0, 0), (1, 1), (1, 1), (0, 0)))
    patches, oh, ow = _extract_patches(xp, 4, 2)
    a = patches.reshape(-1, 16 * cin)
    wm = w.reshape(16 * cin, cout)
    y, stats = matmul_bias_act(a, wm, b, act_mode,
                               want_stats=want_stats, out_dtype=out_dtype)
    M = n * oh * ow
    y = y[:M, :cout].reshape(n, oh, ow, cout)
    return y, stats


def conv_transpose2d(x, w, b, *, act_mode=0, out_dtype=jnp.bfloat16):
    """4x4 / stride-2 / pad-1 ConvTranspose2d via sub-pixel (output-phase)
    decomposition.  x: [N,H,W,Cin], w: [4,4,Cin,Cout].

    out[2q+ry, 2p+rx] = sum_{a,b in {0,1}} xpad[q+ry+a, p+rx+b] * w[sel[a,ry], sel[b,rx]]
    so all four phases share one 2x2 stride-1 patch extraction of pad(x,1) and a
    single matmul with a combined (4*Cin, 4*Cout) weight (exact, 4x fewer MACs)."""
    n, h, wd, cin = x.shape
    cout = w.shape[-1]

    xp = jnp.pad(x.astype(jnp.bfloat16), ((0, 0), (1, 1), (1, 1), (0, 0)))
    patches, oh, ow = _extract_patches(xp, 2, 1)          # oh = h+1, ow = wd+1
    a = patches.reshape(-1, 4 * cin)                      # columns ordered (a, b, cin)

    sel = jnp.array([[3, 2], [1, 0]])                     # [tap, parity] -> k index
    wg = w[sel][:, :, sel]                                # (a, ry, b, rx, cin, cout)
    wg = jnp.transpose(wg, (0, 2, 4, 1, 3, 5))            # (a, b, cin, ry, rx, cout)
    wm = wg.reshape(4 * cin, 4 * cout)                    # cols ordered (ry, rx, cout)
    bm = None if b is None else jnp.tile(b, 4)

    y, _ = matmul_bias_act(a, wm, bm, act_mode, out_dtype=out_dtype)
    M = n * oh * ow
    y = y[:M, :4 * cout].reshape(n, oh, ow, 2, 2, cout)   # (n, py, px, ry, rx, cout)

    # 4-phase interleave (XLA-level; fuses with the following concat / next pad)
    a00 = y[:, :h, :wd, 0, 0, :]
    a01 = y[:, :h, 1:, 0, 1, :]
    a10 = y[:, 1:, :wd, 1, 0, :]
    a11 = y[:, 1:, 1:, 1, 1, :]
    top = jnp.stack([a00, a01], axis=3).reshape(n, h, 2 * wd, cout)   # even rows
    bot = jnp.stack([a10, a11], axis=3).reshape(n, h, 2 * wd, cout)   # odd rows
    return jnp.stack([top, bot], axis=2).reshape(n, 2 * h, 2 * wd, cout)


# ----------------------------------------------------------------------------
# BatchNorm (training mode, batch stats) - scale/shift math stays in f32 jnp
# ----------------------------------------------------------------------------
def _bn_scale_shift(sums, sumsqs, count, gamma, beta, eps=1e-5):
    mean = sums / count
    var = jnp.maximum(sumsqs / count - mean * mean, 0.0)   # biased var (PyTorch BN)
    scale = gamma * jax.lax.rsqrt(var + eps)
    shift = beta - mean * scale
    return scale, shift


def _bn_apply(y, scale, shift, out_dtype=jnp.bfloat16):
    return (y.astype(jnp.float32) * scale + shift).astype(out_dtype)


# ----------------------------------------------------------------------------
# Gen (U-Net, UNET=True) parameters + forward
# ----------------------------------------------------------------------------
ENC_SPECS = [   # (name, cin, cout, act_mode, norm)
    ("enc1", 2, 32, 0, False),
    ("enc2", 32, 64, 2, True),
    ("enc3", 64, 128, 2, True),
    ("enc4", 128, 256, 2, True),
    ("enc5", 256, 256, 2, True),
    ("enc6", 256, 256, 2, True),
    ("enc7", 256, 256, 2, True),
    ("enc8", 256, 256, 2, False),
]
DEC_SPECS = [   # (name, cin, cout, act_mode, norm)
    ("dec8", 256, 256, 1, True),
    ("dec7", 512, 256, 1, True),
    ("dec6", 512, 256, 1, True),
    ("dec5", 512, 256, 1, True),
    ("dec4", 512, 128, 1, True),
    ("dec3", 256, 64, 1, True),
    ("dec2", 128, 32, 1, True),
    ("dec1", 64, 2, 0, False),
]


def init_params(key):
    params = {}
    k = 4
    for name, cin, cout, _, norm in ENC_SPECS + DEC_SPECS:
        key, kw_, kb_ = jax.random.split(key, 3)
        bound = 1.0 / jnp.sqrt(cin * k * k)
        w = jax.random.uniform(kw_, (k, k, cin, cout), jnp.float32, -bound, bound)
        b = jax.random.uniform(kb_, (cout,), jnp.float32, -bound, bound)
        entry = {"w": w, "b": b}
        if norm:
            entry["gamma"] = jnp.ones((cout,), jnp.float32)   # PyTorch BN default init
            entry["beta"] = jnp.zeros((cout,), jnp.float32)
        params[name] = entry
    return params


def gen_forward(params, x_nchw):
    x = jnp.transpose(x_nchw, (0, 2, 3, 1)).astype(jnp.float32)   # -> NHWC

    # ---- encoder ----
    encs = []
    z = x
    for name, _, _, act, norm in ENC_SPECS:
        p = params[name]
        # conv bias followed by batch-stats BN is exactly cancelled -> skip it
        bias = None if norm else p["b"]
        y, stats = conv2d(z, p["w"], bias, act_mode=act, want_stats=norm)
        if norm:
            count = y.shape[0] * y.shape[1] * y.shape[2]
            scale, shift = _bn_scale_shift(stats[0], stats[1], count,
                                           p["gamma"], p["beta"])
            y = _bn_apply(y, scale, shift)        # fused into the next layer by XLA
        z = y
        encs.append(z)
    e1, e2, e3, e4, e5, e6, e7, e8 = encs

    # ---- decoder with U-Net skip connections (UNET=True path) ----
    skips = [e7, e6, e5, e4, e3, e2, e1]
    d = e8
    for idx, (name, _, _, act, norm) in enumerate(DEC_SPECS):
        p = params[name]
        bias = None if norm else p["b"]
        out_dtype = jnp.float32 if name == "dec1" else jnp.bfloat16
        y = conv_transpose2d(d, p["w"], bias, act_mode=act, out_dtype=out_dtype)
        if norm:
            # NOTE: deconv epilogue stats would include one overhang row/col per
            # phase that is not part of the real output, so batch stats are taken
            # here (small f32 jnp reduction over the true interleaved output).
            yf = y.astype(jnp.float32)
            sums = jnp.sum(yf, axis=(0, 1, 2))
            sumsqs = jnp.sum(yf * yf, axis=(0, 1, 2))
            count = y.shape[0] * y.shape[1] * y.shape[2]
            scale, shift = _bn_scale_shift(sums, sumsqs, count,
                                           p["gamma"], p["beta"])
            y = _bn_apply(y, scale, shift)
        if idx < len(skips):
            d = jnp.concatenate([y, skips[idx]], axis=-1)
        else:
            d = y

    return jnp.transpose(d, (0, 3, 1, 2))   # -> NCHW [N, 2, 256, 256]


# ----------------------------------------------------------------------------
# numerical self-check of the Pallas conv / deconv against lax references
# ----------------------------------------------------------------------------
def _conv_ref(x, w, b):
    y = jax.lax.conv_general_dilated(
        x, w, window_strides=(2, 2), padding=((1, 1), (1, 1)),
        dimension_numbers=("NHWC", "HWIO", "NHWC"))
    return y if b is None else y + b


def _conv_transpose_ref(x, w, b):
    y = jax.lax.conv_general_dilated(
        x, w[::-1, ::-1], window_strides=(1, 1), padding=((2, 2), (2, 2)),
        lhs_dilation=(2, 2),
        dimension_numbers=("NHWC", "HWIO", "NHWC"))
    return y if b is None else y + b


def _self_check():
    key = jax.random.PRNGKey(1)
    k1, k2, k3, k4, k5, k6 = jax.random.split(key, 6)

    x = jax.random.normal(k1, (1, 8, 8, 6), jnp.float32)
    w = jax.random.normal(k2, (4, 4, 6, 16), jnp.float32) * 0.1
    b = jax.random.normal(k3, (16,), jnp.float32) * 0.1
    xq = x.astype(jnp.bfloat16).astype(jnp.float32)
    wq = w.astype(jnp.bfloat16).astype(jnp.float32)
    y, _ = conv2d(x, w, b, act_mode=0, out_dtype=jnp.float32)
    yr = _conv_ref(xq, wq, b)
    assert y.shape == yr.shape, (y.shape, yr.shape)
    assert float(jnp.max(jnp.abs(y - yr))) < 3e-2

    xt = jax.random.normal(k4, (1, 4, 4, 6), jnp.float32)
    wt = jax.random.normal(k5, (4, 4, 6, 8), jnp.float32) * 0.1
    bt = jax.random.normal(k6, (8,), jnp.float32) * 0.1
    xtq = xt.astype(jnp.bfloat16).astype(jnp.float32)
    wtq = wt.astype(jnp.bfloat16).astype(jnp.float32)
    yt = conv_transpose2d(xt, wt, bt, act_mode=0, out_dtype=jnp.float32)
    ytr = _conv_transpose_ref(xtq, wtq, bt)
    assert yt.shape == ytr.shape, (yt.shape, ytr.shape)
    assert float(jnp.max(jnp.abs(yt - ytr))) < 3e-2


# ----------------------------------------------------------------------------
# main
# ----------------------------------------------------------------------------
if __name__ == "__main__":
    _self_check()

    key = jax.random.PRNGKey(0)
    kp, kx = jax.random.split(key)
    params = init_params(kp)

    # 8 stride-2 encoders require 256x256 spatial input (bottleneck is 1x1);
    # batch=1, channels=2 is the smallest shape consistent with the module.
    x = jax.random.normal(kx, (1, 2, 256, 256), jnp.float32)

    fwd = jax.jit(gen_forward)
    out = jax.block_until_ready(fwd(params, x))

    assert out.shape == (1, 2, 256, 256), out.shape
    assert bool(jnp.all(jnp.isfinite(out)))
    print("KERNEL_OK")
</pallas_src>

<mosaic_0001>
module attributes {stable_mosaic.version = 11 : i64} {
  func.func @kernel(%arg0: i32, %arg1: i32, %arg2: memref<16x96xbf16, #tpu.memory_space<vmem>>, %arg3: memref<96x16xbf16, #tpu.memory_space<vmem>>, %arg4: memref<1x16xf32, #tpu.memory_space<vmem>>, %arg5: memref<16x16xf32, #tpu.memory_space<vmem>>) attributes {dimension_semantics = [#tpu.dimension_semantics<parallel>, #tpu.dimension_semantics<parallel>], iteration_bounds = array<i64: 1, 1>, scalar_prefetch = 0 : i64, scratch_operands = 0 : i64, tpu.core_type = #tpu.core_type<tc>, window_params = [{transform_indices = @transform_0, window_bounds = array<i64: 16, 96>}, {transform_indices = @transform_1, window_bounds = array<i64: 96, 16>}, {transform_indices = @transform_2, window_bounds = array<i64: 1, 16>}, {transform_indices = @transform_3, window_bounds = array<i64: 16, 16>}]} {
    %c0 = arith.constant 0 : index
    %c0_0 = arith.constant 0 : index
    %0 = vector.load %arg2[%c0, %c0_0] : memref<16x96xbf16, #tpu.memory_space<vmem>>, vector<16x96xbf16>
    %c0_1 = arith.constant 0 : index
    %c0_2 = arith.constant 0 : index
    %1 = vector.load %arg3[%c0_1, %c0_2] : memref<96x16xbf16, #tpu.memory_space<vmem>>, vector<96x16xbf16>
    %cst = arith.constant dense<0.000000e+00> : vector<16x16xf32>
    %2 = tpu.matmul %0, %1, %cst {dimension_numbers = #tpu.dot_dimension_numbers<[1], [0], [0], [1], [0, 0, 1, 1], [], []>} : vector<16x96xbf16>, vector<96x16xbf16>, vector<16x16xf32> -> vector<16x16xf32>
    %c0_3 = arith.constant 0 : index
    %c0_4 = arith.constant 0 : index
    %3 = vector.load %arg4[%c0_3, %c0_4] : memref<1x16xf32, #tpu.memory_space<vmem>>, vector<1x16xf32>
    %4 = vector.broadcast %3 : vector<1x16xf32> to vector<16x16xf32>
    %5 = arith.addf %2, %4 : vector<16x16xf32>
    %c0_5 = arith.constant 0 : index
    %c0_6 = arith.constant 0 : index
    %6 = vector.load %arg5[%c0_5, %c0_6] : memref<16x16xf32, #tpu.memory_space<vmem>>, vector<16x16xf32>
    tpu.vector_store %arg5[%c0_5, %c0_6], %5 {strides = array<i32>} : memref<16x16xf32, #tpu.memory_space<vmem>>, vector<16x16xf32>,
    return
  }
  func.func @transform_0(%arg0: i32, %arg1: i32) -> (i32, i32) {
    %c0_i32 = arith.constant 0 : i32
    %c0_i32_0 = arith.constant 0 : i32
    return %arg0, %c0_i32 : i32, i32
  }
  func.func @transform_1(%arg0: i32, %arg1: i32) -> (i32, i32) {
    %c0_i32 = arith.constant 0 : i32
    %c0_i32_0 = arith.constant 0 : i32
    return %c0_i32, %arg1 : i32, i32
  }
  func.func @transform_2(%arg0: i32, %arg1: i32) -> (i32, i32) {
    %c0_i32 = arith.constant 0 : i32
    %c0_i32_0 = arith.constant 0 : i32
    return %c0_i32, %arg1 : i32, i32
  }
  func.func @transform_3(%arg0: i32, %arg1: i32) -> (i32, i32) {
    %c0_i32 = arith.constant 0 : i32
    return %arg0, %arg1 : i32, i32
  }
}

</mosaic_0001>

<bundles_post_ra>
// kernel: tpu_custom_call.1
= control target key start
LH: loop header
LB: loop body
LE: loop exit
PB: predicated region body
PF: predicated region fallthrough
CT: control target
= control target key end

     0   :  { %v210_v1 = vmov 0.0   ;;  %vm211_vm0 = vmmov 0   ;;  %s271_s0 = inlined_call_operand.vmem [shape: bf16[16,96], index: 0, kind: input, shape index: {}]   ;;  %s272_s1 = inlined_call_operand.vmem [shape: bf16[96,16], index: 1, kind: input, shape index: {}]   ;;  %s273_s2 = inlined_call_operand.vmem [shape: f32[1,16], index: 2, kind: input, shape index: {}]   ;;  %s274_s3 = inlined_call_operand.hbm [shape: f32[16,16], index: 3, kind: output, shape index: {}]  }
   0x1   :  { %v179_v0 = vld [vmem:[%s272_s1] sm:$0xff]   ;;  %158 = vmatprep.subr.bf16.mxu0 %v210_v1  ;;  %v180_v2 = vld [vmem:[%s272_s1 + $0x8] sm:$0xff]   ;;  %170 = vmatprep.mubr.msk.bf16.mxu0 %vm211_vm0, %v210_v1  ;;  %v181_v3 = vld [vmem:[%s272_s1 + $0x10] sm:$0xff]  }
   0x2   :  { %159 = vmatpush3.bf16.msra.mxu0 %v179_v0 }
   0x3   :  { %160 = vmatprep.subr.bf16.mxu0 %v210_v1 }
   0x6   :  { %161 = vmatpush3.bf16.msra.mxu0 %v180_v2 }
   0x7   :  { %162 = vmatprep.subr.bf16.mxu0 %v210_v1 }
   0x8   :  { %8 = vsyncpa [#allocation3], 0  ;;  %v182_v4 = vld [vmem:[%s272_s1 + $0x18] sm:$0xff]   ;;  %v183_v5 = vld [vmem:[%s272_s1 + $0x20] sm:$0xff]   ;;  %vm78_vm1 = vcmask 785408   ;;  %s212_s28 = smov [#allocation2]  }
   0x9   :  { %v184_v6 = vld [vmem:[%s272_s1 + $0x28] sm:$0xff]   ;;  %v185_v7 = vld [vmem:[%s271_s0] sm:$0xff]   ;;  %s131_s29 = sshll.u32 %s212_s28, 4  ;;  %vm123_vm2 = vcmask 130048   ;;  %s132_s29 = int_to_ptr.vmem [resolvable:$true] %s131_s29 }
   0xa   :  { %163 = vmatpush3.bf16.msra.mxu0 %v181_v3  ;;  %v142_v8 = vld [vmem:[%s273_s2] ss:$0 sm:$0xff]  ;;  %s186_s0 = scalar_lea.vmem %s132_s29, 256  ;;  %p191_p1 = scmp.lt.s32.totalorder %s132_s29, %s132_s29 }
   0xb   :  { %164 = vmatprep.subr.bf16.mxu0 %v210_v1  ;;  %p187_p0 = scmp.ne.s32.totalorder %s132_s29, %s186_s0  ;;  %p192_p2 = scmp.lt.s32.totalorder %s186_s0, %s186_s0 }
   0xd   :  { %p193_p3 = por %p192_p2, %p191_p1 }
   0xe   :  { %165 = vmatpush3.bf16.msra.mxu0 %v182_v4 }
   0xf   :  { %166 = vmatprep.subr.bf16.mxu0 %v210_v1  ;;  %p194_p4 = pnand %p193_p3, %p187_p0 }
  0x12   :  { %167 = vmatpush3.bf16.msra.mxu0 %v183_v5 }
  0x13   :  { %168 = vmatprep.subr.bf16.mxu0 %v210_v1 }
  0x16   :  { %169 = vmatpush3.bf16.msra.mxu0 %v184_v6 }
  0x19   :  { %171 = vmatmul.mubr.msk.bf16.vlgmr.msra.gmra.mrb[0].mxu0 %vm78_vm1, %v185_v7 }
  0xec   :  { %v116_v9 = vpop.f32.mrb[0].mxu0 }
  0xed   :  { %v117_v10 = vadd.f32 %v142_v8, %v116_v9  ;;  %v172_v11 = vpop.f32.mrb[1].mxu0 }
  0xee   :  { %v119_v12 = vpop.f32.mrb[2].mxu0 }
  0xef   :  { %124 = vst.msk [vmem:[#allocation2] sm:$0xff] %vm123_vm2, %v117_v10  ;;  %v120_v13 = vadd.f32 %v142_v8, %v119_v12  ;;  %v173_v14 = vpop.f32.mrb[3].mxu0 }
  0xf1   :  { %125 = vst.msk [vmem:[#allocation2 + $0x8] sm:$0xff] %vm123_vm2, %v120_v13 }
  0xf2   :  { %197 = shalt.err (!%p194_p4)
}
  0xf3   :  { %s198_s30 = scalar_lea.hbm %s274_s3, 256 }
  0xf4   :  { %p199_p5 = scmp.ne.s32.totalorder %s274_s3, %s198_s30  ;;  %p202_p6 = scmp.lt.u32.totalorder %s198_s30, %s274_s3 }
  0xf6   :  { %p204_p7 = pnand %p202_p6, %p199_p5 }
  0xf8   :  { %207 = shalt.err (!%p204_p7)
}
  0xf9   :  { %s213_s8 = smov 128   ;;  %s214_s9 = smov 8  }
  0xfa   :  { %137 = dma.vmem_to_hbm [thread:$0]  %s132_s29, 256, %s274_s3, [#allocation3], %s213_s8, %s213_s8, %s214_s9  }
  0xfb   :  { %208 = dma.done.wait [#allocation3], 256  }
  0xfc   :  { %209 = vsyncadd [#allocation3], 4294967040 }
  0xfd   :  { %141 = vsyncpa [#allocation3], 1 }

</bundles_post_ra>
